<compile_context>
chip_gen: v7x
topology: tpu7x:2x2x1
jax: 0.10.0
libtpu: 0.0.40
codegen_flags: <defaults>
</compile_context>

<pallas_src>
import functools

import numpy as np
import jax
import jax.numpy as jnp
from jax import lax
from jax.experimental import pallas as pl
from jax.experimental.pallas import tpu as pltpu


def _attn_rel_vec_kernel(x_ref, w_ref, er_ref, g_ref, b_ref, o_ref, acc_ref,
                         *, num_heads, head_dim, seq_len, eps):
    H, D, S = num_heads, head_dim, seq_len
    h = pl.program_id(1)

    # ---- per-head fused QKV projection: one (S,E)x(E,3D) MXU matmul ----------
    x = x_ref[0]                                                    # (S, E) bf16
    qkv = jnp.dot(x, w_ref[0], preferred_element_type=jnp.float32)  # (S, 3D) f32
    q = qkv[:, :D].astype(jnp.bfloat16)       # already scaled by E**-0.5 (folded into Wq)
    k = qkv[:, D:2 * D].astype(jnp.bfloat16)
    v = qkv[:, 2 * D:].astype(jnp.bfloat16)

    # ---- relative-position logits: QEr = q @ Er^T (one 2-D MXU matmul) -------
    qer = jnp.einsum('sd,td->st', q, er_ref[...],
                     preferred_element_type=jnp.float32)            # (S, S) f32

    # ---- skew(): exact pad-left -> reshape(S+1,S) -> drop-row-0 semantics:
    #   Srel[i, j] = QEr[i,   S-1-i+j]  for j <= i
    #              = 0                   for j == i+1
    #              = QEr[i+1, j-i-2]     for j >= i+2  (unmasked, as in forward())
    # Register-level: A[i,:] = row i of QEr right-rotated by (i+1), built from a
    # base rotate-by-1 plus a log2(S) binary decomposition of the per-row amount
    # (static rolls + per-row iota selects), then combined with A shifted up one
    # row and two selects.  No scratch stores, no O(S) unrolling.
    row = lax.broadcasted_iota(jnp.int32, (S, S), 0)
    col = lax.broadcasted_iota(jnp.int32, (S, S), 1)
    a = jnp.roll(qer, 1, axis=-1)
    shift = 1
    while shift < S:
        a = jnp.where((row & shift) != 0, jnp.roll(a, shift, axis=-1), a)
        shift *= 2
    a_next = jnp.roll(a, -1, axis=0)          # a_next[i, :] = A[i+1, :]
    srel = jnp.where(col <= row, a,
                     jnp.where(col == row + 1, jnp.float32(0.0), a_next))

    # ---- content logits + softmax (f32 VPU/EUP math) --------------------------
    scores = jnp.einsum('qd,kd->qk', q, k,
                        preferred_element_type=jnp.float32)          # (S, S) f32
    logits = scores + srel                    # E**-0.5 already folded into q
    m = jnp.max(logits, axis=-1, keepdims=True)
    e = jnp.exp(logits - m)
    l = jnp.sum(e, axis=-1, keepdims=True)

    # ---- attention output; softmax normalization deferred to (S,D) -----------
    out_h = jnp.dot(e.astype(jnp.bfloat16), v,
                    preferred_element_type=jnp.float32)              # (S, D) f32
    out_h = out_h * pl.reciprocal(l, approx=True)                    # EUP, not VALU
    acc_ref[h] = out_h

    # ---- last head: merge heads, single-pass LayerNorm, one full-width store -
    @pl.when(h == H - 1)
    def _():
        outs = acc_ref[...]                                          # (H, S, D) f32
        merged = jnp.concatenate([outs[i] for i in range(H)], axis=-1)  # (S, E)
        mean = jnp.mean(merged, axis=-1, keepdims=True)
        var = jnp.mean(merged * merged, axis=-1, keepdims=True) - mean * mean
        normed = (merged - mean) * lax.rsqrt(var + eps)
        o_ref[0] = normed * g_ref[...] + b_ref[...]


def attention_rel_vec(x, wq, wk, wv, er, gamma, beta, *, num_heads, eps=1e-5):
    B, S, E = x.shape
    H = num_heads
    D = E // H
    scale = E ** (-0.5)

    # ---- host-side weight prep (zero in-kernel cost) -------------------------
    # torch Linear (no bias): y = x @ W^T ; head h owns output columns [h*D,(h+1)*D).
    def heads(w):                              # w: (E_out, E_in) torch layout
        wt = w.T                               # (E_in, E_out)
        return jnp.stack([wt[:, i * D:(i + 1) * D] for i in range(H)], axis=0)  # (H,E,D)

    wqkv_heads = jnp.concatenate(
        [heads(wq * scale),                    # softmax scale folded into the q projection
         heads(wk), heads(wv)], axis=-1).astype(jnp.bfloat16)        # (H, E, 3D)

    x_bf = x.astype(jnp.bfloat16)              # halve x DMA (MXU inputs are bf16 anyway)
    er_bf = er.astype(jnp.bfloat16)

    kernel = functools.partial(_attn_rel_vec_kernel, num_heads=H, head_dim=D,
                               seq_len=S, eps=eps)

    grid_spec = pltpu.PrefetchScalarGridSpec(
        num_scalar_prefetch=0,
        grid=(B, H),                                       # heads innermost: one (S,S) live at a time
        in_specs=[
            pl.BlockSpec((1, S, E), lambda b, h: (b, 0, 0)),        # x (resident across h)
            pl.BlockSpec((1, E, 3 * D), lambda b, h: (h, 0, 0)),    # per-head fused Wqkv (pipelined)
            pl.BlockSpec((S, D), lambda b, h: (0, 0)),              # Er (grid-invariant)
            pl.BlockSpec((1, E), lambda b, h: (0, 0)),              # LayerNorm gamma
            pl.BlockSpec((1, E), lambda b, h: (0, 0)),              # LayerNorm beta
        ],
        out_specs=pl.BlockSpec((1, S, E), lambda b, h: (b, 0, 0)),  # written at h == H-1
        scratch_shapes=[pltpu.VMEM((H, S, D), jnp.float32)],        # per-head pre-LN outputs
    )

    # Explicit scoped-VMEM budget: double-buffered blocks + scratch + the
    # per-head (S,S)/(S,E) temporary working set, with 2x headroom.
    bytes_blocks = (2 * (S * E * 2 + E * 3 * D * 2)        # x, per-head Wqkv (bf16, 2 bufs)
                    + S * D * 2 + 2 * E * 4                # Er, gamma, beta
                    + 2 * S * E * 4)                       # output block (f32, 2 bufs)
    bytes_temps = 8 * S * S * 4 + 4 * S * E * 4 + H * S * D * 4
    vmem_limit = int(min(max(2 * (bytes_blocks + bytes_temps), 32 * 1024 * 1024),
                         64 * 1024 * 1024))

    return pl.pallas_call(
        kernel,
        out_shape=jax.ShapeDtypeStruct((B, S, E), jnp.float32),
        grid_spec=grid_spec,
        compiler_params=pltpu.CompilerParams(
            dimension_semantics=("parallel", "arbitrary"),
            vmem_limit_bytes=vmem_limit),
    )(x_bf, wqkv_heads, er_bf, gamma.reshape(1, E), beta.reshape(1, E))


def reference(x, wq, wk, wv, er, gamma, beta, num_heads, eps=1e-5,
              matmul_dtype=jnp.float32):
    """Pure-JAX transcription of the PyTorch forward.

    With matmul_dtype=float32 this is exactly the module.  With bfloat16 it
    mirrors the kernel's MXU input precision (f32 accumulation everywhere);
    softmax / LayerNorm math stays f32, matching the kernel."""
    B, S, E = x.shape
    H, D = num_heads, E // num_heads
    f32 = jnp.float32
    c = lambda a: a.astype(matmul_dtype)
    q = jnp.einsum('bse,fe->bsf', c(x), c(wq), preferred_element_type=f32)
    k = jnp.einsum('bse,fe->bsf', c(x), c(wk), preferred_element_type=f32)
    v = jnp.einsum('bse,fe->bsf', c(x), c(wv), preferred_element_type=f32)
    q = q.reshape(B, S, H, D).transpose(0, 2, 1, 3)
    k = k.reshape(B, S, H, D).transpose(0, 2, 1, 3)
    v = v.reshape(B, S, H, D).transpose(0, 2, 1, 3)
    qer = jnp.einsum('bhsd,td->bhst', c(q), c(er), preferred_element_type=f32)
    padded = jnp.pad(qer, ((0, 0), (0, 0), (0, 0), (1, 0)))
    srel = padded.reshape(B, H, S + 1, S)[:, :, 1:, :]
    attn = (jnp.einsum('bhsd,bhtd->bhst', c(q), c(k), preferred_element_type=f32)
            + srel) * (E ** -0.5)
    attn = jax.nn.softmax(attn, axis=-1)
    out = jnp.einsum('bhst,bhtd->bhsd', c(attn), c(v), preferred_element_type=f32)
    out = out.transpose(0, 2, 1, 3).reshape(B, S, E)
    mean = out.mean(-1, keepdims=True)
    var = ((out - mean) ** 2).mean(-1, keepdims=True)
    return (out - mean) / jnp.sqrt(var + eps) * gamma + beta


if __name__ == "__main__":
    B, S, E, H = 2, 8, 32, 4          # batch, seq_len, emb_size, num_heads
    D = E // H

    key = jax.random.PRNGKey(0)
    kx, kq, kk, kv, ke = jax.random.split(key, 5)
    x = jax.random.normal(kx, (B, S, E), jnp.float32)
    bound = 1.0 / float(np.sqrt(E))
    wq = jax.random.uniform(kq, (E, E), jnp.float32, -bound, bound)
    wk = jax.random.uniform(kk, (E, E), jnp.float32, -bound, bound)
    wv = jax.random.uniform(kv, (E, E), jnp.float32, -bound, bound)
    er = jax.random.normal(ke, (S, D), jnp.float32)          # self.Er
    gamma = jnp.ones((E,), jnp.float32)                      # LayerNorm default init
    beta = jnp.zeros((E,), jnp.float32)

    out = attention_rel_vec(x, wq, wk, wv, er, gamma, beta, num_heads=H)
    out = jax.block_until_ready(out)

    # Validate against the module's math with matching MXU input precision
    # (bf16 inputs, f32 accumulation).  Remaining delta: approx reciprocal in the
    # softmax, scale folding and accumulation-order differences — all far below 2e-2.
    ref = reference(x, wq, wk, wv, er, gamma, beta, H, matmul_dtype=jnp.bfloat16)
    err = float(np.max(np.abs(np.asarray(out) - np.asarray(ref))))
    assert np.allclose(np.asarray(out), np.asarray(ref), atol=2e-2, rtol=2e-2), err

    print("KERNEL_OK")
</pallas_src>

<mosaic_0001>
module attributes {stable_mosaic.version = 11 : i64} {
  func.func @_attn_rel_vec_kernel(%arg0: i32, %arg1: i32, %arg2: memref<1x8x32xbf16, #tpu.memory_space<vmem>>, %arg3: memref<1x32x24xbf16, #tpu.memory_space<vmem>>, %arg4: memref<8x8xbf16, #tpu.memory_space<vmem>>, %arg5: memref<1x32xf32, #tpu.memory_space<vmem>>, %arg6: memref<1x32xf32, #tpu.memory_space<vmem>>, %arg7: memref<1x8x32xf32, #tpu.memory_space<vmem>>, %arg8: memref<4x8x8xf32, #tpu.memory_space<vmem>>) attributes {dimension_semantics = [#tpu.dimension_semantics<parallel>, #tpu.dimension_semantics<arbitrary>], iteration_bounds = array<i64: 2, 4>, scalar_prefetch = 0 : i64, scratch_operands = 1 : i64, tpu.core_type = #tpu.core_type<tc>, window_params = [{transform_indices = @transform_0, window_bounds = array<i64: 1, 8, 32>}, {transform_indices = @transform_1, window_bounds = array<i64: 1, 32, 24>}, {pipeline_mode = #tpu.pipeline_mode<synchronous>, transform_indices = @transform_2, window_bounds = array<i64: 8, 8>}, {pipeline_mode = #tpu.pipeline_mode<synchronous>, transform_indices = @transform_3, window_bounds = array<i64: 1, 32>}, {pipeline_mode = #tpu.pipeline_mode<synchronous>, transform_indices = @transform_4, window_bounds = array<i64: 1, 32>}, {transform_indices = @transform_5, window_bounds = array<i64: 1, 8, 32>}]} {
    %c0 = arith.constant 0 : index
    %c0_0 = arith.constant 0 : index
    %c0_1 = arith.constant 0 : index
    %0 = vector.load %arg2[%c0, %c0_0, %c0_1] : memref<1x8x32xbf16, #tpu.memory_space<vmem>>, vector<1x8x32xbf16>
    %1 = vector.shape_cast %0 : vector<1x8x32xbf16> to vector<8x32xbf16>
    %c0_2 = arith.constant 0 : index
    %c0_3 = arith.constant 0 : index
    %c0_4 = arith.constant 0 : index
    %2 = vector.load %arg3[%c0_2, %c0_3, %c0_4] : memref<1x32x24xbf16, #tpu.memory_space<vmem>>, vector<1x32x24xbf16>
    %3 = vector.shape_cast %2 : vector<1x32x24xbf16> to vector<32x24xbf16>
    %cst = arith.constant dense<0.000000e+00> : vector<8x24xf32>
    %4 = tpu.matmul %1, %3, %cst {dimension_numbers = #tpu.dot_dimension_numbers<[1], [0], [0], [1], [0, 0, 1, 1], [], []>} : vector<8x32xbf16>, vector<32x24xbf16>, vector<8x24xf32> -> vector<8x24xf32>
    %5 = vector.extract_strided_slice %4 {offsets = [0, 0], sizes = [8, 8], strides = [1, 1]} : vector<8x24xf32> to vector<8x8xf32>
    %6 = arith.truncf %5 : vector<8x8xf32> to vector<8x8xbf16>
    %7 = vector.extract_strided_slice %4 {offsets = [0, 8], sizes = [8, 8], strides = [1, 1]} : vector<8x24xf32> to vector<8x8xf32>
    %8 = arith.truncf %7 : vector<8x8xf32> to vector<8x8xbf16>
    %9 = vector.extract_strided_slice %4 {offsets = [0, 16], sizes = [8, 8], strides = [1, 1]} : vector<8x24xf32> to vector<8x8xf32>
    %10 = arith.truncf %9 : vector<8x8xf32> to vector<8x8xbf16>
    %c0_5 = arith.constant 0 : index
    %c0_6 = arith.constant 0 : index
    %11 = vector.load %arg4[%c0_5, %c0_6] : memref<8x8xbf16, #tpu.memory_space<vmem>>, vector<8x8xbf16>
    "tpu.trace_start"() <{level = 10 : i32, message = "sd,td->st"}> : () -> ()
    %cst_7 = arith.constant dense<0.000000e+00> : vector<8x8xf32>
    %12 = tpu.matmul %6, %11, %cst_7 {dimension_numbers = #tpu.dot_dimension_numbers<[1], [1], [0], [0], [0, 0, 1, 0], [], []>} : vector<8x8xbf16>, vector<8x8xbf16>, vector<8x8xf32> -> vector<8x8xf32>
    "tpu.trace_stop"() : () -> ()
    %13 = tpu.iota {dimensions = array<i32: 0>} : vector<8x8xi32>
    %14 = tpu.iota {dimensions = array<i32: 1>} : vector<8x8xi32>
    %15 = vector.extract_strided_slice %12 {offsets = [0, 7], sizes = [8, 1], strides = [1, 1]} : vector<8x8xf32> to vector<8x1xf32>
    %16 = vector.extract_strided_slice %12 {offsets = [0, 0], sizes = [8, 7], strides = [1, 1]} : vector<8x8xf32> to vector<8x7xf32>
    %17 = tpu.concatenate %15, %16 in 1 : vector<8x1xf32>, vector<8x7xf32> -> vector<8x8xf32>
    %c1_i32 = arith.constant 1 : i32
    %18 = vector.broadcast %c1_i32 : i32 to vector<8x8xi32>
    %19 = arith.andi %13, %18 : vector<8x8xi32>
    %c0_i32 = arith.constant 0 : i32
    %20 = vector.broadcast %c0_i32 : i32 to vector<8x8xi32>
    %21 = arith.cmpi ne, %19, %20 : vector<8x8xi32>
    %22 = vector.extract_strided_slice %17 {offsets = [0, 7], sizes = [8, 1], strides = [1, 1]} : vector<8x8xf32> to vector<8x1xf32>
    %23 = vector.extract_strided_slice %17 {offsets = [0, 0], sizes = [8, 7], strides = [1, 1]} : vector<8x8xf32> to vector<8x7xf32>
    %24 = tpu.concatenate %22, %23 in 1 : vector<8x1xf32>, vector<8x7xf32> -> vector<8x8xf32>
    %25 = arith.select %21, %24, %17 : vector<8x8xi1>, vector<8x8xf32>
    %c2_i32 = arith.constant 2 : i32
    %26 = vector.broadcast %c2_i32 : i32 to vector<8x8xi32>
    %27 = arith.andi %13, %26 : vector<8x8xi32>
    %c0_i32_8 = arith.constant 0 : i32
    %28 = vector.broadcast %c0_i32_8 : i32 to vector<8x8xi32>
    %29 = arith.cmpi ne, %27, %28 : vector<8x8xi32>
    %30 = vector.extract_strided_slice %25 {offsets = [0, 6], sizes = [8, 2], strides = [1, 1]} : vector<8x8xf32> to vector<8x2xf32>
    %31 = vector.extract_strided_slice %25 {offsets = [0, 0], sizes = [8, 6], strides = [1, 1]} : vector<8x8xf32> to vector<8x6xf32>
    %32 = tpu.concatenate %30, %31 in 1 : vector<8x2xf32>, vector<8x6xf32> -> vector<8x8xf32>
    %33 = arith.select %29, %32, %25 : vector<8x8xi1>, vector<8x8xf32>
    %c4_i32 = arith.constant 4 : i32
    %34 = vector.broadcast %c4_i32 : i32 to vector<8x8xi32>
    %35 = arith.andi %13, %34 : vector<8x8xi32>
    %c0_i32_9 = arith.constant 0 : i32
    %36 = vector.broadcast %c0_i32_9 : i32 to vector<8x8xi32>
    %37 = arith.cmpi ne, %35, %36 : vector<8x8xi32>
    %38 = vector.extract_strided_slice %33 {offsets = [0, 4], sizes = [8, 4], strides = [1, 1]} : vector<8x8xf32> to vector<8x4xf32>
    %39 = vector.extract_strided_slice %33 {offsets = [0, 0], sizes = [8, 4], strides = [1, 1]} : vector<8x8xf32> to vector<8x4xf32>
    %40 = tpu.concatenate %38, %39 in 1 : vector<8x4xf32>, vector<8x4xf32> -> vector<8x8xf32>
    %41 = arith.select %37, %40, %33 : vector<8x8xi1>, vector<8x8xf32>
    %42 = vector.extract_strided_slice %41 {offsets = [1, 0], sizes = [7, 8], strides = [1, 1]} : vector<8x8xf32> to vector<7x8xf32>
    %43 = vector.extract_strided_slice %41 {offsets = [0, 0], sizes = [1, 8], strides = [1, 1]} : vector<8x8xf32> to vector<1x8xf32>
    %44 = tpu.concatenate %42, %43 in 0 : vector<7x8xf32>, vector<1x8xf32> -> vector<8x8xf32>
    %45 = arith.cmpi sle, %14, %13 : vector<8x8xi32>
    %c1_i32_10 = arith.constant 1 : i32
    %46 = vector.broadcast %c1_i32_10 : i32 to vector<8x8xi32>
    %47 = arith.addi %13, %46 : vector<8x8xi32>
    %48 = arith.cmpi eq, %14, %47 : vector<8x8xi32>
    %cst_11 = arith.constant 0.000000e+00 : f32
    %49 = vector.broadcast %cst_11 : f32 to vector<8x8xf32>
    %50 = arith.select %48, %49, %44 : vector<8x8xi1>, vector<8x8xf32>
    %51 = arith.select %45, %41, %50 : vector<8x8xi1>, vector<8x8xf32>
    "tpu.trace_start"() <{level = 10 : i32, message = "qd,kd->qk"}> : () -> ()
    %cst_12 = arith.constant dense<0.000000e+00> : vector<8x8xf32>
    %52 = tpu.matmul %6, %8, %cst_12 {dimension_numbers = #tpu.dot_dimension_numbers<[1], [1], [0], [0], [0, 0, 1, 0], [], []>} : vector<8x8xbf16>, vector<8x8xbf16>, vector<8x8xf32> -> vector<8x8xf32>
    "tpu.trace_stop"() : () -> ()
    %53 = arith.addf %52, %51 : vector<8x8xf32>
    %cst_13 = arith.constant dense<0xFF800000> : vector<8xf32>
    %54 = vector.multi_reduction <maximumf>, %53, %cst_13 [1] : vector<8x8xf32> to vector<8xf32>
    %55 = vector.shape_cast %54 : vector<8xf32> to vector<8x1xf32>
    %56 = vector.broadcast %55 : vector<8x1xf32> to vector<8x8xf32>
    %57 = arith.subf %53, %56 : vector<8x8xf32>
    %58 = math.exp %57 : vector<8x8xf32>
    %cst_14 = arith.constant dense<0.000000e+00> : vector<8xf32>
    %59 = vector.multi_reduction <add>, %58, %cst_14 [1] : vector<8x8xf32> to vector<8xf32>
    %60 = vector.shape_cast %59 : vector<8xf32> to vector<8x1xf32>
    %61 = arith.truncf %58 : vector<8x8xf32> to vector<8x8xbf16>
    %cst_15 = arith.constant dense<0.000000e+00> : vector<8x8xf32>
    %62 = tpu.matmul %61, %10, %cst_15 {dimension_numbers = #tpu.dot_dimension_numbers<[1], [0], [0], [1], [0, 0, 1, 1], [], []>} : vector<8x8xbf16>, vector<8x8xbf16>, vector<8x8xf32> -> vector<8x8xf32>
    %63 = tpu.reciprocal %60 {approx = true} : vector<8x1xf32> -> vector<8x1xf32>
    %64 = vector.broadcast %63 : vector<8x1xf32> to vector<8x8xf32>
    %65 = arith.mulf %62, %64 : vector<8x8xf32>
    %66 = arith.index_cast %arg1 : i32 to index
    %c0_16 = arith.constant 0 : index
    %c0_17 = arith.constant 0 : index
    %67 = vector.load %arg8[%66, %c0_16, %c0_17] : memref<4x8x8xf32, #tpu.memory_space<vmem>>, vector<1x8x8xf32>
    %68 = vector.shape_cast %67 : vector<1x8x8xf32> to vector<8x8xf32>
    %69 = vector.shape_cast %65 : vector<8x8xf32> to vector<1x8x8xf32>
    tpu.vector_store %arg8[%66, %c0_16, %c0_17], %69 {strides = array<i32>} : memref<4x8x8xf32, #tpu.memory_space<vmem>>, vector<1x8x8xf32>,
    %c3_i32 = arith.constant 3 : i32
    %70 = arith.cmpi eq, %arg1, %c3_i32 : i32
    %71 = arith.extui %70 : i1 to i32
    %c0_i32_18 = arith.constant 0 : i32
    %72 = arith.cmpi ne, %71, %c0_i32_18 : i32
    scf.if %72 {
      %c0_19 = arith.constant 0 : index
      %c0_20 = arith.constant 0 : index
      %c0_21 = arith.constant 0 : index
      %73 = vector.load %arg8[%c0_19, %c0_20, %c0_21] : memref<4x8x8xf32, #tpu.memory_space<vmem>>, vector<4x8x8xf32>
      %74 = vector.extract_strided_slice %73 {offsets = [0, 0, 0], sizes = [1, 8, 8], strides = [1, 1, 1]} : vector<4x8x8xf32> to vector<1x8x8xf32>
      %75 = vector.shape_cast %74 : vector<1x8x8xf32> to vector<8x8xf32>
      %76 = vector.extract_strided_slice %73 {offsets = [1, 0, 0], sizes = [1, 8, 8], strides = [1, 1, 1]} : vector<4x8x8xf32> to vector<1x8x8xf32>
      %77 = vector.shape_cast %76 : vector<1x8x8xf32> to vector<8x8xf32>
      %78 = vector.extract_strided_slice %73 {offsets = [2, 0, 0], sizes = [1, 8, 8], strides = [1, 1, 1]} : vector<4x8x8xf32> to vector<1x8x8xf32>
      %79 = vector.shape_cast %78 : vector<1x8x8xf32> to vector<8x8xf32>
      %80 = vector.extract_strided_slice %73 {offsets = [3, 0, 0], sizes = [1, 8, 8], strides = [1, 1, 1]} : vector<4x8x8xf32> to vector<1x8x8xf32>
      %81 = vector.shape_cast %80 : vector<1x8x8xf32> to vector<8x8xf32>
      %82 = tpu.concatenate %75, %77, %79, %81 in 1 : vector<8x8xf32>, vector<8x8xf32>, vector<8x8xf32>, vector<8x8xf32> -> vector<8x32xf32>
      %cst_22 = arith.constant dense<0.000000e+00> : vector<8xf32>
      %83 = vector.multi_reduction <add>, %82, %cst_22 [1] : vector<8x32xf32> to vector<8xf32>
      %84 = vector.shape_cast %83 : vector<8xf32> to vector<8x1xf32>
      %cst_23 = arith.constant 3.200000e+01 : f32
      %85 = vector.broadcast %cst_23 : f32 to vector<8x1xf32>
      %86 = arith.divf %84, %85 : vector<8x1xf32>
      %87 = arith.mulf %82, %82 : vector<8x32xf32>
      %cst_24 = arith.constant dense<0.000000e+00> : vector<8xf32>
      %88 = vector.multi_reduction <add>, %87, %cst_24 [1] : vector<8x32xf32> to vector<8xf32>
      %89 = vector.shape_cast %88 : vector<8xf32> to vector<8x1xf32>
      %cst_25 = arith.constant 3.200000e+01 : f32
      %90 = vector.broadcast %cst_25 : f32 to vector<8x1xf32>
      %91 = arith.divf %89, %90 : vector<8x1xf32>
      %92 = arith.mulf %86, %86 : vector<8x1xf32>
      %93 = arith.subf %91, %92 : vector<8x1xf32>
      %94 = vector.broadcast %86 : vector<8x1xf32> to vector<8x32xf32>
      %95 = arith.subf %82, %94 : vector<8x32xf32>
      %cst_26 = arith.constant 9.99999974E-6 : f32
      %96 = vector.broadcast %cst_26 : f32 to vector<8x1xf32>
      %97 = arith.addf %93, %96 : vector<8x1xf32>
      %98 = math.rsqrt %97 : vector<8x1xf32>
      %99 = vector.broadcast %98 : vector<8x1xf32> to vector<8x32xf32>
      %100 = arith.mulf %95, %99 : vector<8x32xf32>
      %c0_27 = arith.constant 0 : index
      %c0_28 = arith.constant 0 : index
      %101 = vector.load %arg5[%c0_27, %c0_28] : memref<1x32xf32, #tpu.memory_space<vmem>>, vector<1x32xf32>
      %102 = vector.broadcast %101 : vector<1x32xf32> to vector<8x32xf32>
      %103 = arith.mulf %100, %102 : vector<8x32xf32>
      %c0_29 = arith.constant 0 : index
      %c0_30 = arith.constant 0 : index
      %104 = vector.load %arg6[%c0_29, %c0_30] : memref<1x32xf32, #tpu.memory_space<vmem>>, vector<1x32xf32>
      %105 = vector.broadcast %104 : vector<1x32xf32> to vector<8x32xf32>
      %106 = arith.addf %103, %105 : vector<8x32xf32>
      %c0_31 = arith.constant 0 : index
      %c0_32 = arith.constant 0 : index
      %c0_33 = arith.constant 0 : index
      %107 = vector.load %arg7[%c0_31, %c0_32, %c0_33] : memref<1x8x32xf32, #tpu.memory_space<vmem>>, vector<1x8x32xf32>
      %108 = vector.shape_cast %107 : vector<1x8x32xf32> to vector<8x32xf32>
      %109 = vector.shape_cast %106 : vector<8x32xf32> to vector<1x8x32xf32>
      tpu.vector_store %arg7[%c0_31, %c0_32, %c0_33], %109 {strides = array<i32>} : memref<1x8x32xf32, #tpu.memory_space<vmem>>, vector<1x8x32xf32>,
    } else {
    }
    return
  }
  func.func @transform_0(%arg0: i32, %arg1: i32) -> (i32, i32, i32) {
    %c0_i32 = arith.constant 0 : i32
    %c0_i32_0 = arith.constant 0 : i32
    %c0_i32_1 = arith.constant 0 : i32
    return %arg0, %c0_i32, %c0_i32_0 : i32, i32, i32
  }
  func.func @transform_1(%arg0: i32, %arg1: i32) -> (i32, i32, i32) {
    %c0_i32 = arith.constant 0 : i32
    %c0_i32_0 = arith.constant 0 : i32
    %c0_i32_1 = arith.constant 0 : i32
    return %arg1, %c0_i32, %c0_i32_0 : i32, i32, i32
  }
  func.func @transform_2(%arg0: i32, %arg1: i32) -> (i32, i32) {
    %c0_i32 = arith.constant 0 : i32
    %c0_i32_0 = arith.constant 0 : i32
    %c0_i32_1 = arith.constant 0 : i32
    return %c0_i32, %c0_i32_0 : i32, i32
  }
  func.func @transform_3(%arg0: i32, %arg1: i32) -> (i32, i32) {
    %c0_i32 = arith.constant 0 : i32
    %c0_i32_0 = arith.constant 0 : i32
    %c0_i32_1 = arith.constant 0 : i32
    return %c0_i32, %c0_i32_0 : i32, i32
  }
  func.func @transform_4(%arg0: i32, %arg1: i32) -> (i32, i32) {
    %c0_i32 = arith.constant 0 : i32
    %c0_i32_0 = arith.constant 0 : i32
    %c0_i32_1 = arith.constant 0 : i32
    return %c0_i32, %c0_i32_0 : i32, i32
  }
  func.func @transform_5(%arg0: i32, %arg1: i32) -> (i32, i32, i32) {
    %c0_i32 = arith.constant 0 : i32
    %c0_i32_0 = arith.constant 0 : i32
    %c0_i32_1 = arith.constant 0 : i32
    return %arg0, %c0_i32, %c0_i32_0 : i32, i32, i32
  }
}

</mosaic_0001>

<bundles_post_ra>
// kernel: tpu_custom_call.1
= control target key start
LH: loop header
LB: loop body
LE: loop exit
PB: predicated region body
PF: predicated region fallthrough
CT: control target
= control target key end

     0   :  { %10 = vsyncpa [#allocation4], 0  ;;  %s1150_s0 = inlined_call_operand.vmem [shape: bf16[2,8,32], index: 0, kind: input, shape index: {}]   ;;  %s1151_s1 = inlined_call_operand.vmem [shape: bf16[4,32,24], index: 1, kind: input, shape index: {}]   ;;  %s1152_s2 = inlined_call_operand.vmem [shape: bf16[8,8], index: 2, kind: input, shape index: {}]   ;;  %s1153_s3 = inlined_call_operand.vmem [shape: f32[1,32], index: 3, kind: input, shape index: {}]   ;;  %s1154_s4 = inlined_call_operand.vmem [shape: f32[1,32], index: 4, kind: input, shape index: {}]   ;;  %s1155_s5 = inlined_call_operand.hbm [shape: f32[2,8,32], index: 5, kind: output, shape index: {}]  }
   0x1   :  { %12 = vsyncpa [#allocation4 + $0x1], 0  ;;  %s978_s18 = smov 0   ;;  %s980_s19 = smov 0  }
   0x2   :  { %s982_s20 = smov 0   ;;  %s984_s21 = smov 0  }
   0x3   :  { %s986_s22 = smov 0   ;;  %s988_s23 = smov 0  }
   0x4   :  { %s990_s24 = smov 0   ;;  %s992_s25 = smov 0  }
   0x5 LB: > { %s687_s26 = sadd.s32 4294967295, %s932_s25   ;;  %s688_s27 = sadd.s32 4294967294, %s932_s25   ;;  %s932_s25 = sphi %s992_s25, %s18_s25   ;;  %s928_s24 = sphi %s990_s24, %s1164_s24   ;;  %s924_s23 = sphi %s988_s23, %s1163_s23   ;;  %s920_s22 = sphi %s986_s22, %s1162_s22   ;;  %s916_s21 = sphi %s984_s21, %s1161_s21   ;;  %s912_s20 = sphi %s982_s20, %s1160_s20   ;;  %s908_s19 = sphi %s980_s19, %s1159_s19   ;;  %s904_s18 = sphi %s978_s18, %s1158_s18  }
   0x6   : > { %s27_s28 = sadd.s32 1, %s924_s23  ;;  %s30_s29 = sadd.s32 1, %s928_s24 }
   0x7   : > { %p28_p0 = scmp.ge.s32.totalorder %s27_s28, 4  ;;  %p162_p1 = scmp.ne.s32.totalorder %s912_s20, %s908_s19 }
   0x8   : > { %p163_p2 = scmp.eq.s32.totalorder %s687_s26, 7  ;;  %p168_p4 = scmp.ne.s32.totalorder %s908_s19, %s904_s18 }
   0x9   : > { %s1166_s28 = smov (%p28_p0, %s27_s28), 0  ;;  %s1168_s29 = smov (!%p28_p0, %s30_s29), %s928_s24 }
   0xa   : > { %p1027_p3 = por %p163_p2, %p162_p1  ;;  %p32_p5 = scmp.ge.s32.totalorder %s1168_s29, 2 }
   0xb   : > { %p169_p6 = scmp.eq.s32.totalorder %s688_s27, 7  ;;  %p691_p7 = scmp.ge.s32.totalorder %s932_s25, 1 }
   0xc   : > { %p211_p8 = scmp.lt.s32.totalorder %s932_s25, 9  ;;  %s1170_s29 = smov (%p32_p5, %s1168_s29), 0 }
   0xd   : > { %p1037_p9 = por %p169_p6, %p168_p4  ;;  %s149_s7 = ssub.s32 %s928_s24, %s1170_s29 }
   0xe   : > { %p212_p10 = pnand %p691_p7, %p211_p8  ;;  %s152_s8 = sadd.s32 1, %s912_s20 }
   0xf   : > { %p150_p11 = scmp.eq.s32.totalorder %s149_s7, 0  ;;  %s240_s10 = sand.u32 (!%p212_p10), 1, %s908_s19   ;;  %vm316_vm0 = vcmask (!%p212_p10), 64512   ;;  %v934_v0 = vmov (!%p212_p10), 0.0   ;;  %vm935_vm1 = vmmov (!%p212_p10), 0   ;;  %vm270_vm2 = vcmask (!%p212_p10), 261120  }
  0x10   : > { %215 = sbr.rel (%p212_p10) target bundleno = 1630 (0x65e), region = 40  ;;  %p247_p12 = scmp.lt.s32.totalorder (!%p212_p10), %s916_s21, 3  ;;  %720 = vmatprep.subr.bf16.mxu0 (!%p212_p10), %v934_v0  ;;  %724 = vmatprep.mubr.msk.bf16.mxu0 (!%p212_p10), %vm935_vm1, %v934_v0  ;;  %v315_v1 = vld [vmem:[%s1152_s2] sm:$0xf] (!%p212_p10)  ;;  %vm374_vm3 = vcmask (!%p212_p10), 7168   ;;  %v363_v24 = vlaneseq (!%p212_p10)  ;;  %vm396_vm5 = vcmask (!%p212_p10), 15360  }
  0x11   : > { %s1045_s9 = scalar_select %p150_p11, %s912_s20, %s152_s8  }
  0x12   : > { %s1051_s11 = sshll.u32 (!%p212_p10), %s240_s10, 3  ;;  %p243_p13 = scmp.lt.s32.totalorder (!%p212_p10), %s920_s22, 1  ;;  %728 = vmatprep.subr.bf16.mxu1 (!%p212_p10), %v934_v0  ;;  %v321_v2 = vsel (!%p212_p10), %vm316_vm0, %v315_v1, 0  ;;  %730 = vmatprep.mubr.msk.bf16.mxu1 (!%p212_p10), %vm935_vm1, %v934_v0  ;;  %v364_v25 = vshrl.u32 (!%p212_p10), %v363_v24, 7  ;;  %vm408_vm7 = vcmask (!%p212_p10), 31744   ;;  %v366_v37 = vand.u32 (!%p212_p10), 127, %v363_v24 }
  0x13   : > { %729 = vmatpush3.bf16.xpose.msra.mxu1 (!%p212_p10), %v321_v2  ;;  %s939_s17 = smov (!%p212_p10), 2   ;;  %s940_s26 = smov (!%p212_p10), 122   ;;  %vm482_vm9 = vcmask (!%p212_p10), 1043456  }
  0x14   : > { %740 = vmatprep.subr.bf16.mxu1 (!%p212_p10), %v934_v0  ;;  %v376_v26 = vand.u32 (!%p212_p10), 1, %v364_v25  ;;  %v387_v31 = vand.u32 (!%p212_p10), 2, %v364_v25  ;;  %s943_s8 = smov (!%p212_p10), 112   ;;  %v399_v36 = vand.u32 (!%p212_p10), 4, %v364_v25  ;;  %v417_v38 = vadd.s32 (!%p212_p10), 1, %v364_v25  ;;  %s702_s12 = sshll.u32 (!%p212_p10), %s916_s21, 3 }
  0x15   : > { %vm416_vm11 = vcmp.le.s32.totalorder (!%p212_p10), %v366_v37, %v364_v25  ;;  %p703_p0 = scmp.ne.s32.totalorder (!%p212_p10), %s916_s21, 3 }
  0x16   : > { %vm377_vm4 = vcmp.ne.s32.totalorder (!%p212_p10), %v376_v26, 0  ;;  %vm388_vm6 = vcmp.ne.s32.totalorder (!%p212_p10), %v387_v31, 0  ;;  %vm400_vm8 = vcmp.ne.s32.totalorder (!%p212_p10), %v399_v36, 0  ;;  %vm418_vm10 = vcmp.eq.s32.totalorder (!%p212_p10), %v366_v37, %v417_v38 }
  0x17   : > { %s248_s14 = scalar_select %p247_p12, %s916_s21, 3 }
  0x18   : > { %s244_s15 = scalar_select %p243_p13, %s920_s22, 1 }
  0x19   : > { %s710_s16 = sshll.u32 %s248_s14, 4  ;;  %s936_s14 = smov 120   ;;  %vm552_vm12 = vcmask (!%p703_p0), 130048   ;;  %vm554_vm13 = vcmask (!%p703_p0), 195584  }
  0x1a   : > { %s251_s27 = scalar_lea.vmem %s1151_s1, %s710_s16  ;;  %s693_s7 = sshll.u32 %s244_s15, 2 }
  0x1b   : > { %v830_v3 = vld [vmem:[%s251_s27] sm:$0xff]   ;;  %v831_v4 = vld [vmem:[%s251_s27 + $0x8] sm:$0xff]   ;;  %s246_s13 = scalar_lea.vmem %s1150_s0, %s693_s7  ;;  %s937_s15 = smov 1  }
  0x1c   : > { %721 = vmatpush3.bf16.msra.mxu0 %v830_v3  ;;  %v253_v5 = vld [vmem:[%s246_s13] sm:$0xf]  ;;  %s938_s16 = smov 121   ;;  %s941_s27 = smov 4  }
  0x1d   : > { %722 = vmatprep.subr.bf16.mxu0 %v934_v0  ;;  %s942_s7 = smov 124   ;;  %s529_s13 = scalar_lea.vmem [#allocation2], %s702_s12 }
  0x20   : > { %723 = vmatpush3.bf16.msra.mxu0 %v831_v4 }
  0x21   : > { %734 = vmatprep.subr.bf16.mxu0 %v934_v0 }
  0x23   : > { %725 = vmatmul.mubr.msk.bf16.vlgmr.msra.gmra.mrb[0].mxu0 %vm270_vm2, %v253_v5 }
  0x24   : > { %736 = vmatprep.mubr.msk.bf16.mxu0 %vm935_vm1, %v934_v0 }
  0xf6   : > { %v308_v6 = vpop.f32.mrb[0].mxu0 }
  0xf7   : > { %v314_v7 = vpack.c.bf16 %v308_v6, %v308_v6  ;;  %v726_v8 = vpop.f32.mrb[1].mxu0 }
  0xf8   : > { %v311_v9 = vpop.f32.mrb[2].mxu0 }
  0xf9   : > { %422 = vrot.lane.b32.xlu0 %v314_v7, %s936_s14  ;;  %v727_v10 = vpop.f32.mrb[3].mxu0  ;;  %731 = vmatmul.mubr.msk.bf16.vlgmr.msra.gmra.mrb[0].mxu1 %vm316_vm0, %v314_v7  ;;  %s242_s14 = scalar_lea.vmem [#allocation3], %s1051_s11 }
  0xfa   : > { %742 = vmatprep.mubr.msk.bf16.mxu1 %vm935_vm1, %v934_v0 }
 0x16b   : > { %v423_v11 = vpop.permute.xlu0 %422 }
 0x16c   : > { %v425_v12 = vsel %vm316_vm0, %v423_v11, 0 }
 0x16d   : > { %735 = vmatpush3.bf16.xpose.msra.mxu0 %v425_v12 }
 0x174   : > { %737 = vmatmul.mubr.msk.bf16.vlgmr.msra.gmra.mrb[4].mxu0 %vm316_vm0, %v314_v7 }
 0x1cc   : > { %v357_v13 = vpop.f32.mrb[0].mxu1 }
 0x1cd   : > { %371 = vrot.lane.b32.xlu1 %v357_v13, %s937_s15  ;;  %368 = vrot.lane.b32.xlu0 %v357_v13, %s938_s16  ;;  %v732_v14 = vpop.f32.mrb[1].mxu1 }
 0x1ce   : > { %v360_v15 = vpop.f32.mrb[2].mxu1 }
 0x1cf   : > { %v733_v16 = vpop.f32.mrb[3].mxu1 }
 0x23f   : > { %v372_v17 = vpop.permute.xlu1 %371  ;;  %v369_v18 = vpop.permute.xlu0 %368 }
 0x240   : > { %v375_v19 = vsel %vm374_vm3, %v369_v18, %v372_v17 }
 0x241   : > { %382 = vrot.lane.b32.xlu0 %v375_v19, %s937_s15  ;;  %379 = vrot.lane.b32.xlu1 %v375_v19, %s938_s16  ;;  %s944_s15 = smov (!%p703_p0), 8   ;;  %s945_s16 = smov (!%p703_p0), 24  }
 0x247   : > { %v461_v20 = vpop.f32.mrb[4].mxu0 }
 0x248   : > { %v738_v21 = vpop.f32.mrb[5].mxu0 }
 0x249   : > { %v464_v22 = vpop.f32.mrb[6].mxu0  ;;  %v704_v21 = vld [vmem:[%s1153_s3] ss:$0 sm:$0xff] (!%p703_p0) }
 0x24a   : > { %v739_v23 = vpop.f32.mrb[7].mxu0 }
 0x24b   : > { %v705_v23 = vld [vmem:[%s1154_s4] ss:$0 sm:$0xff] (!%p703_p0) }
 0x2b3   : > { %v383_v27 = vpop.permute.xlu0 %382  ;;  %v380_v28 = vpop.permute.xlu1 %379 }
 0x2b4   : > { %v385_v29 = vsel %vm374_vm3, %v380_v28, %v383_v27 }
 0x2b5   : > { %v386_v30 = vsel %vm377_vm4, %v385_v29, %v375_v19 }
 0x2b6   : > { %393 = vrot.lane.b32.xlu0 %v386_v30, %s939_s17  ;;  %390 = vrot.lane.b32.xlu1 %v386_v30, %s940_s26  ;;  %s946_s17 = smov (!%p703_p0), 16  }
 0x328   : > { %v394_v32 = vpop.permute.xlu0 %393  ;;  %v391_v33 = vpop.permute.xlu1 %390 }
 0x329   : > { %v397_v34 = vsel %vm396_vm5, %v391_v33, %v394_v32 }
 0x32a   : > { %v398_v35 = vsel %vm388_vm6, %v397_v34, %v386_v30 }
 0x32b   : > { %405 = vrot.lane.b32.xlu0 %v398_v35, %s941_s27  ;;  %402 = vrot.lane.b32.xlu1 %v398_v35, %s942_s7 }
 0x32f   : > { %477 = vrot.lane.b32.xlu0 %v314_v7, %s943_s8 }
 0x39d   : > { %v406_v39 = vpop.permute.xlu0 %405  ;;  %v403_v40 = vpop.permute.xlu1 %402 }
 0x39e   : > { %v409_v41 = vsel %vm408_vm7, %v403_v40, %v406_v39 }
 0x39f   : > { %v410_v42 = vsel %vm400_vm8, %v409_v41, %v398_v35 }
 0x3a0   : > { %v412_v43 = vrot.slane %v410_v42, 1 }
 0x3a1   : > { %v478_v44 = vpop.permute.xlu0 %477 }
 0x3a2   : > { %v484_v45 = vsel %vm482_vm9, %v478_v44, 0  ;;  %v419_v46 = vsel %vm418_vm10, 0.0, %v412_v43 }
 0x3a3   : > { %741 = vmatpush3.bf16.msra.mxu1 %v484_v45  ;;  %v420_v47 = vsel %vm416_vm11, %v410_v42, %v419_v46 }
 0x3a4   : > { %v462_v48 = vadd.f32 %v461_v20, %v420_v47 }
 0x3a6   : > { %v467_v49 = vsel %vm316_vm0, %v462_v48, -inf }
 0x3a7   : > { %468 = vmax.xlane.f32.xlu1 %v467_v49 }
 0x434   : > { %v469_v50 = vpop.xlane.xlu1 %468 }
 0x435   : > { %v470_v51 = vsub.f32 %v462_v48, %v469_v50 }
 0x437   : > { %v471_v52 = vmul.f32 1.442695, %v470_v51 }
 0x439   : > { %832 = vpow2.f32 %v471_v52 }
 0x443   : > { %v833_v53 = vpop.eup %832 }
 0x444   : > { %v473_v54 = vsel %vm316_vm0, %v833_v53, 0.0  ;;  %v476_v55 = vpack.c.bf16 %v833_v53, %v833_v53 }
 0x445   : > { %474 = vadd.xlane.f32.xlu0 %v473_v54 }
 0x446   : > { %743 = vmatmul.mubr.msk.bf16.vlgmr.msra.gmra.mrb[4].mxu1 %vm316_vm0, %v476_v55 }
 0x4d2   : > { %v475_v56 = vpop.xlane.xlu0 %474 }
 0x4d3   : > { %834 = vrcp.f32 %v475_v56 }
 0x4dd   : > { %v835_v57 = vpop.eup %834 }
 0x516   : > { %534 = sbr.rel (%p703_p0) target bundleno = 1606 (0x646), region = 44 }
 0x519   : > { %v520_v58 = vpop.f32.mrb[4].mxu1 }
 0x51a   : > { %v527_v59 = vmul.f32 %v835_v57, %v520_v58  ;;  %v744_v60 = vpop.f32.mrb[5].mxu1 }
 0x51b   : > { %v523_v61 = vpop.f32.mrb[6].mxu1 }
 0x51c   : > { %530 = vst.msk [vmem:[%s529_s13] sm:$0xff] %vm316_vm0, %v527_v59  ;;  %v745_v62 = vpop.f32.mrb[7].mxu1 }
 0x523   : > { %v536_v63 = vld [vmem:[#allocation2 + $0x8] sm:$0xff]  ;;  %v538_v0 = vld [vmem:[#allocation2 + $0x18] sm:$0xff]  ;;  %v537_v1 = vld [vmem:[#allocation2 + $0x10] sm:$0xff] }
 0x524   : > { %540 = vrot.lane.b32.xlu0 %v536_v63, %s944_s15  ;;  %548 = vrot.lane.b32.xlu1 %v538_v0, %s945_s16  ;;  %v535_v3 = vld [vmem:[#allocation2] sm:$0xff] }
 0x528   : > { %544 = vrot.lane.b32.xlu0 %v537_v1, %s946_s17 }
 0x596   : > { %v541_v2 = vpop.permute.xlu0 %540  ;;  %v549_v4 = vpop.permute.xlu1 %548 }
 0x597   : > { %v551_v5 = vsel %vm316_vm0, %v535_v3, %v541_v2 }
 0x59a   : > { %v545_v6 = vpop.permute.xlu0 %544 }
 0x59b   : > { %v553_v7 = vsel %vm552_vm12, %v551_v5, %v545_v6 }
 0x59c   : > { %v555_v8 = vsel %vm554_vm13, %v553_v7, %v549_v4 }
 0x59d   : > { %v556_v9 = vsel %vm270_vm2, %v555_v8, 0.0  ;;  %v561_v10 = vmul.f32 %v555_v8, %v555_v8 }
 0x59e   : > { %557 = vadd.xlane.f32.xlu1 %v556_v9 }
 0x59f   : > { %v562_v11 = vsel %vm270_vm2, %v561_v10, 0.0 }
 0x5a0   : > { %563 = vadd.xlane.f32.xlu0 %v562_v11 }
 0x62b   : > { %v558_v12 = vpop.xlane.xlu1 %557 }
 0x62c   : > { %v560_v13 = vmul.f32 0.03125, %v558_v12 }
 0x62d   : > { %v564_v14 = vpop.xlane.xlu0 %563 }
 0x62e   : > { %v566_v15 = vmul.f32 %v560_v13, %v560_v13  ;;  %v565_v16 = vmul.f32 0.03125, %v564_v14  ;;  %v568_v19 = vsub.f32 %v555_v8, %v560_v13 }
 0x630   : > { %v567_v17 = vsub.f32 %v565_v16, %v566_v15 }
 0x632   : > { %v569_v18 = vadd.f32 1e-05, %v567_v17 }
 0x634   : > { %836 = vrsqrt.f32 %v569_v18 }
 0x63e   : > { %v837_v20 = vpop.eup %836 }
 0x63f   : > { %v571_v22 = vmul.f32 %v837_v20, %v568_v19 }
 0x641   : > { %v579_v24 = vmul.f32 %v704_v21, %v571_v22 }
 0x643   : > { %v587_v25 = vadd.f32 %v705_v23, %v579_v24 }
 0x645   : > { %588 = vst.msk [vmem:[%s242_s14] sm:$0xff] %vm270_vm2, %v587_v25 }
 0x646 PF: > { %s707_s8 = sshll.u32 %s920_s22, 7  ;;  %s603_s16 = sshll.u32 %s242_s14, 4  ;;  %s604_s16 = int_to_ptr.vmem [resolvable:$true] %s603_s16 }
 0x647   : > { %s1099_s15 = scalar_lea.hbm %s1155_s5, %s707_s8  ;;  %s590_s17 = scalar_lea.sflag [#allocation4], %s240_s10 }
 0x648   : > { %s838_s21 = scalar_lea.vmem %s604_s16, 128  ;;  %s947_s26 = smov [#allocation3]  }
 0x649   : > { %p839_p1 = scmp.ne.s32.totalorder %s604_s16, %s838_s21  ;;  %s842_s27 = sshll.u32 %s947_s26, 4  ;;  %s843_s27 = int_to_ptr.vmem [resolvable:$false] %s842_s27 }
 0x64a   : > { %s844_s7 = scalar_lea.vmem %s843_s27, 256  ;;  %p845_p5 = scmp.lt.s32.totalorder %s604_s16, %s843_s27 }
 0x64b   : > { %p840_p2 = pnand %p839_p1, %p1027_p3  ;;  %p846_p6 = scmp.lt.s32.totalorder %s844_s7, %s838_s21 }
 0x64d   : > { %p841_p4 = pneg %p840_p2  ;;  %p847_p7 = por %p846_p6, %p845_p5 }
 0x64f   : > { %p848_p8 = pnand %p847_p7, %p841_p4 }
 0x651   : > { %851 = shalt.err (!%p848_p8)
}
 0x652   : > { %s852_s22 = scalar_lea.hbm %s1099_s15, 128  ;;  %s856_s14 = scalar_lea.hbm %s1155_s5, 256 }
 0x653   : > { %p853_p10 = scmp.ne.s32.totalorder %s1099_s15, %s852_s22  ;;  %p857_p13 = scmp.lt.u32.totalorder %s1099_s15, %s1155_s5 }
 0x654   : > { %p858_p0 = scmp.lt.u32.totalorder %s856_s14, %s852_s22  ;;  %p860_p2 = scmp.lt.u32.totalorder %s852_s22, %s1099_s15 }
 0x655   : > { %p854_p11 = pnand %p853_p10, %p1027_p3 }
 0x656   : > { %p859_p1 = por %p858_p0, %p857_p13 }
 0x657   : > { %p855_p12 = pneg %p854_p11 }
 0x658   : > { %p861_p4 = por %p860_p2, %p859_p1 }
 0x65a   : > { %p862_p5 = pnand %p861_p4, %p855_p12 }
 0x65c   : > { %865 = shalt.err (!%p862_p5)
}
 0x65d   : > { %746 = dma.vmem_to_hbm [thread:$0]  (%p1027_p3), %s604_s16, 128, %s1099_s15, %s590_s17  }
 0x65e PF: > { %p752_p6 = scmp.ge.s32.totalorder %s932_s25, 2  ;;  %s615_s13 = sand.u32 1, %s904_s18  }
 0x65f   : > { %s616_s21 = scalar_lea.sflag [#allocation4], %s615_s13 }
 0x660   : > { %p749_p7 = pnand %p752_p6, %p1037_p9 }
 0x662   : > { %899 = dma.done.wait (!%p749_p7), %s616_s21, 128  }
 0x663   : > { %901 = vsyncadd (!%p749_p7), %s616_s21, 4294967168  ;;  %s18_s25 = sadd.s32 1, %s932_s25   ;;  %s1158_s18 = smov %s908_s19 }
 0x664   : > { %p15_p8 = scmp.ge.s32.totalorder %s18_s25, 10   ;;  %s1159_s19 = smov %s912_s20 }
 0x665   : > { %s1160_s20 = smov %s1045_s9  ;;  %s1161_s21 = smov %s924_s23 }
 0x666   : > { %s1162_s22 = smov %s928_s24  ;;  %s1163_s23 = smov %s1166_s28 }
 0x667   : > { %s1164_s24 = smov %s1170_s29  ;;  %17 = sbr.rel (!%p15_p8) target bundleno = 5 (0x5), region = 83 }
 0x66e   :  { %621 = vsyncpa [#allocation4], 1 }
 0x66f   :  { %623 = vsyncpa [#allocation4 + $0x1], 1 }

</bundles_post_ra>
